<compile_context>
chip_gen: v6e
topology: v6e:2x2x1
jax: 0.10.0
libtpu: 0.0.40
codegen_flags: <defaults>
</compile_context>

<pallas_src>
import functools

import jax
import jax.numpy as jnp
from jax.experimental import pallas as pl
from jax.experimental.pallas import tpu as pltpu

_LANE = 128
_SPLIT_MIN_BYTES = 1 * 1024 * 1024   # force >=2 grid steps above this size


def _target_block_bytes():
    """Per-operand block size: 2 MiB on v5e and older, 4 MiB on v6e/v7x."""
    try:
        kind = jax.devices()[0].device_kind.lower()
    except Exception:
        kind = ""
    if any(tag in kind for tag in ("v2", "v3", "v4", "v5")):
        return 2 * 1024 * 1024
    return 4 * 1024 * 1024


def _sublane(itemsize):
    # 8 rows for 4-byte, 16 for 2-byte, 32 for 1-byte dtypes.
    return max(8, 32 // itemsize)


def _row_block(num_rows, itemsize):
    sub = _sublane(itemsize)
    target = _target_block_bytes() // (_LANE * itemsize)
    target = max(sub, (target // sub) * sub)
    if num_rows > target:
        return target
    # Whole tensor fits in one block.  If it is big enough to be worth
    # splitting, force >= 2 blocks so a 2-TensorCore chip (v7x) can shard the
    # "parallel" grid axis; tiny tensors stay as one full-extent block.
    if num_rows * _LANE * itemsize > _SPLIT_MIN_BYTES and num_rows > sub:
        half = (num_rows + 1) // 2
        half = ((half + sub - 1) // sub) * sub
        return min(half, num_rows)
    return num_rows


def _ema_kernel(mu_ref, x_ref, shadow_ref, out_ref):
    # new = shadow + mu * (x - shadow)  ==  mu*x + (1-mu)*shadow
    # Compute in f32 so low-precision shadows don't lose small updates; the
    # kernel is HBM-bound so the VPU casts are free.
    mu = mu_ref[0]
    x = x_ref[...].astype(jnp.float32)
    s = shadow_ref[...].astype(jnp.float32)
    out_ref[...] = (s + mu * (x - s)).astype(out_ref.dtype)


def _ema_2d(mu_arr, x2d, shadow2d):
    R, C = x2d.shape
    itemsize = x2d.dtype.itemsize
    tr = _row_block(R, itemsize)
    block_bytes = tr * C * itemsize
    return pl.pallas_call(
        _ema_kernel,
        out_shape=jax.ShapeDtypeStruct((R, C), x2d.dtype),
        grid_spec=pl.GridSpec(
            grid=(pl.cdiv(R, tr),),
            in_specs=[
                pl.BlockSpec(memory_space=pltpu.MemorySpace.SMEM),  # mu scalar
                pl.BlockSpec((tr, C), lambda i: (i, 0)),            # x
                pl.BlockSpec((tr, C), lambda i: (i, 0)),            # shadow
            ],
            out_specs=pl.BlockSpec((tr, C), lambda i: (i, 0)),
        ),
        # EMA semantically overwrites the shadow: write the output in place
        # over the shadow's HBM buffer instead of allocating a fresh one.
        input_output_aliases={2: 0},
        cost_estimate=pl.CostEstimate(
            flops=3 * R * C,
            transcendentals=0,
            bytes_accessed=3 * R * C * itemsize,
        ),
        compiler_params=pltpu.CompilerParams(
            # Row blocks are independent; lets v7x shard the grid across its
            # two TensorCores (no-op on single-TC v5e/v6e).
            dimension_semantics=("parallel",),
            # 3 operands x 2 pipeline buffers + headroom, stated explicitly so
            # the generation-dependent block size never collides with a
            # default scoped-VMEM limit.
            vmem_limit_bytes=max(16 * 1024 * 1024,
                                 6 * block_bytes + 4 * 1024 * 1024),
        ),
    )(mu_arr, x2d, shadow2d)


def _to_slab(val):
    """Flatten + zero-pad to a lane-dense (rows, 128) slab (one-time cost)."""
    n = val.size
    rows = max(1, pl.cdiv(n, _LANE))
    flat = val.reshape(-1)
    if rows * _LANE != n:
        flat = jnp.pad(flat, (0, rows * _LANE - n))
    return flat.reshape(rows, _LANE)


@functools.partial(jax.jit, donate_argnums=(1,))
def _ema_step(x, shadow_slab, mu_arr):
    """One EMA step. Returns (new shadow slab, new average in x's shape)."""
    n = x.size
    rows = shadow_slab.shape[0]
    padded = rows * _LANE
    xf = x.reshape(-1)
    if padded != n:
        xf = jnp.pad(xf, (0, padded - n))
    new_slab = _ema_2d(mu_arr, xf.reshape(rows, _LANE), shadow_slab)
    new_flat = new_slab.reshape(-1)
    if padded != n:
        new_flat = new_flat[:n]
    return new_slab, new_flat.reshape(x.shape)


class EMA:
    """JAX/Pallas port of the PyTorch EMA module.

    forward(name, x):
        new_average = mu * x + (1 - mu) * shadow[name]
        shadow[name] = new_average
        return new_average
    """

    # TODO(synk): for models with many small parameters, concatenating all
    # registered tensors into one slab and running a single pallas_call per
    # step would amortize dispatch overhead; the per-name API below matches
    # the original module.

    def __init__(self, mu):
        self.mu = float(mu)
        self._mu_arr = jnp.full((1,), self.mu, dtype=jnp.float32)
        self.shadow = {}   # name -> current average, original shape (as torch)
        self._slab = {}    # name -> kernel-ready (rows, 128) padded slab

    def register(self, name, val):
        val = jnp.asarray(val)
        self.shadow[name] = val            # the "clone"
        self._slab[name] = _to_slab(val)   # in-place-updated kernel buffer

    def forward(self, name, x):
        assert name in self._slab
        x = jnp.asarray(x)
        assert x.shape == self.shadow[name].shape
        assert x.dtype == self._slab[name].dtype
        new_slab, new_average = _ema_step(x, self._slab[name], self._mu_arr)
        self._slab[name] = new_slab
        self.shadow[name] = new_average
        return new_average

    __call__ = forward


if __name__ == "__main__":
    key = jax.random.PRNGKey(0)
    k1, k2, k3, k4 = jax.random.split(key, 4)

    mu = 0.9
    ema = EMA(mu)

    # Small NCHW-style feature tensor (size divides 128: pure-slab hot path).
    shape = (2, 4, 16, 16)
    x1 = jax.random.normal(k1, shape, dtype=jnp.float32)
    init_val = jax.random.normal(k2, shape, dtype=jnp.float32)
    ema.register("feat", init_val)

    out1 = jax.block_until_ready(ema.forward("feat", x1))
    ref1 = mu * x1 + (1.0 - mu) * init_val
    assert jnp.allclose(out1, ref1, atol=1e-6, rtol=1e-6)
    assert jnp.allclose(ema.shadow["feat"], ref1, atol=1e-6, rtol=1e-6)

    # Second step chains through the in-place shadow slab.
    x1b = jax.random.normal(k3, shape, dtype=jnp.float32)
    out2 = jax.block_until_ready(ema.forward("feat", x1b))
    ref2 = mu * x1b + (1.0 - mu) * ref1
    assert jnp.allclose(out2, ref2, atol=1e-5, rtol=1e-5)

    # Parameter whose size is NOT a multiple of 128 (padded-slab path; no
    # concatenate, shadow still updated in place).
    bshape = (5, 37)
    xb = jax.random.normal(k4, bshape, dtype=jnp.float32)
    vb = jnp.full(bshape, 0.5, dtype=jnp.float32)
    ema.register("bias", vb)
    out3 = jax.block_until_ready(ema.forward("bias", xb))
    ref3 = mu * xb + (1.0 - mu) * vb
    assert jnp.allclose(out3, ref3, atol=1e-6, rtol=1e-6)

    print("KERNEL_OK")
</pallas_src>

<mosaic_0001>
module attributes {stable_mosaic.version = 11 : i64} {
  func.func @_ema_kernel(%arg0: i32, %arg1: memref<1xf32, #tpu.memory_space<smem>>, %arg2: memref<16x128xf32, #tpu.memory_space<vmem>>, %arg3: memref<16x128xf32, #tpu.memory_space<vmem>>, %arg4: memref<16x128xf32, #tpu.memory_space<vmem>>) attributes {dimension_semantics = [#tpu.dimension_semantics<parallel>], iteration_bounds = array<i64: 1>, scalar_prefetch = 0 : i64, scratch_operands = 0 : i64, tpu.core_type = #tpu.core_type<tc>, window_params = [{transform_indices = @transform_0, window_bounds = array<i64: 1>}, {transform_indices = @transform_1, window_bounds = array<i64: 16, 128>}, {transform_indices = @transform_2, window_bounds = array<i64: 16, 128>}, {transform_indices = @transform_3, window_bounds = array<i64: 16, 128>}]} {
    %c0 = arith.constant 0 : index
    %0 = memref.load %arg1[%c0] : memref<1xf32, #tpu.memory_space<smem>>
    %c0_0 = arith.constant 0 : index
    %c0_1 = arith.constant 0 : index
    %1 = vector.load %arg2[%c0_0, %c0_1] : memref<16x128xf32, #tpu.memory_space<vmem>>, vector<16x128xf32>
    %c0_2 = arith.constant 0 : index
    %c0_3 = arith.constant 0 : index
    %2 = vector.load %arg3[%c0_2, %c0_3] : memref<16x128xf32, #tpu.memory_space<vmem>>, vector<16x128xf32>
    %3 = arith.subf %1, %2 : vector<16x128xf32>
    %4 = vector.broadcast %0 : f32 to vector<16x128xf32>
    %5 = arith.mulf %4, %3 : vector<16x128xf32>
    %6 = arith.addf %2, %5 : vector<16x128xf32>
    %c0_4 = arith.constant 0 : index
    %c0_5 = arith.constant 0 : index
    %7 = vector.load %arg4[%c0_4, %c0_5] : memref<16x128xf32, #tpu.memory_space<vmem>>, vector<16x128xf32>
    tpu.vector_store %arg4[%c0_4, %c0_5], %6 {strides = array<i32>} : memref<16x128xf32, #tpu.memory_space<vmem>>, vector<16x128xf32>,
    return
  }
  func.func @transform_0(%arg0: i32) -> i32 {
    %c0_i32 = arith.constant 0 : i32
    %c0_i32_0 = arith.constant 0 : i32
    return %c0_i32 : i32
  }
  func.func @transform_1(%arg0: i32) -> (i32, i32) {
    %c0_i32 = arith.constant 0 : i32
    %c0_i32_0 = arith.constant 0 : i32
    return %arg0, %c0_i32 : i32, i32
  }
  func.func @transform_2(%arg0: i32) -> (i32, i32) {
    %c0_i32 = arith.constant 0 : i32
    %c0_i32_0 = arith.constant 0 : i32
    return %arg0, %c0_i32 : i32, i32
  }
  func.func @transform_3(%arg0: i32) -> (i32, i32) {
    %c0_i32 = arith.constant 0 : i32
    %c0_i32_0 = arith.constant 0 : i32
    return %arg0, %c0_i32 : i32, i32
  }
}

</mosaic_0001>

<bundles_post_ra>
// kernel: _ema_step.1
= control target key start
LH: loop header
LB: loop body
LE: loop exit
PB: predicated region body
PF: predicated region fallthrough
CT: control target
= control target key end

     0   :  { %s74_s0 = inlined_call_operand.<no memory space> [shape: f32[1], index: 0, kind: input, shape index: {}]   ;;  %s75_s1 = inlined_call_operand.vmem [shape: f32[16,128], index: 1, kind: input, shape index: {}]   ;;  %s76_s2 = inlined_call_operand.vmem [shape: f32[16,128], index: 2, kind: input, shape index: {}, may-alias: {2,3}]   ;;  %s77_s3 = inlined_call_operand.vmem [shape: f32[16,128], index: 3, kind: output, shape index: {}, may-alias: {2,3}]  }
   0x1   :  { %v16_v0 = vld [vmem:[%s75_s1] sm:$0xff]  ;;  %v22_v2 = vstv %s74_s0  ;;  %v17_v3 = vld [vmem:[%s75_s1 + $0x8] sm:$0xff] }
   0x2   :  { %v18_v1 = vld [vmem:[%s76_s2] sm:$0xff]  ;;  %v19_v5 = vld [vmem:[%s76_s2 + $0x8] sm:$0xff] }
   0x3   :  { %v20_v4 = vsub.f32 %v16_v0, %v18_v1  ;;  %v21_v6 = vsub.f32 %v17_v3, %v19_v5 }
   0x5   :  { %v23_v7 = vmul.f32 %v22_v2, %v20_v4  ;;  %v24_v8 = vmul.f32 %v22_v2, %v21_v6 }
   0x7   :  { %v25_v9 = vadd.f32 %v23_v7, %v18_v1  ;;  %v26_v10 = vadd.f32 %v24_v8, %v19_v5 }
   0x9   :  { %27 = vst [vmem:[%s77_s3] sm:$0xff] %v25_v9  ;;  %28 = vst [vmem:[%s77_s3 + $0x8] sm:$0xff] %v26_v10 }

</bundles_post_ra>
